<compile_context>
chip_gen: v5e
topology: v5e:2x2
jax: 0.10.0
libtpu: 0.0.40
codegen_flags: <defaults>
</compile_context>

<pallas_src>
import functools

import jax
import jax.numpy as jnp
from jax import lax
from jax.experimental import pallas as pl
from jax.experimental.pallas import tpu as pltpu


N_PAD = 128  # lane-dense output width; nOut is zero-padded up to this


# ----------------------------- Pallas kernel ------------------------------- #
def bilstm_kernel(x_ref, wih_ref, whh_ref, b_ref, wemb_ref, bemb_ref,
                  out_ref, *, T, B, H):
    """Fused bidirectional LSTM + Linear embedding (block-diagonal form).

    x_ref    : (T*2B, 2*nIn)  time-block rows: [0,B) = [x[t] | 0]   (forward)
                                               [B,2B) = [0 | x[T-1-t]] (backward)
    wih_ref  : (2*nIn, 4H)    vstack(W_ih_fwd.T, W_ih_bwd.T)
    whh_ref  : (2H,    4H)    vstack(W_hh_fwd.T, W_hh_bwd.T)
    b_ref    : (T*2B,  4H)    per-row bias (fwd rows: b_f, bwd rows: b_b)
    wemb_ref : (2H, N_PAD)    embedding weight, transposed, zero-padded lanes
    bemb_ref : (1,  N_PAD)
    out_ref  : (T*B, N_PAD)   lane-dense output; caller slices [:, :nOut]
    """
    H2, H4 = 2 * H, 4 * H
    B2 = 2 * B

    # Whole-sequence, both-direction input projection: one MXU matmul.
    gx = jnp.dot(x_ref[...], wih_ref[...],
                 preferred_element_type=jnp.float32) + b_ref[...]     # (T*2B, 4H)

    whh = whh_ref[...]                                                # (2H, 4H)

    # Per-lane constants turning ONE tanh into all four gate nonlinearities:
    #   sigmoid(x) = 0.5*tanh(0.5*x) + 0.5   on i, f, o lanes
    #   tanh(x)                              on g lanes
    # PyTorch gate order along lanes: [i | f | g | o], each H wide.
    # Built once at full (2B, 4H) shape (no in-loop re-broadcast).
    lane4 = lax.broadcasted_iota(jnp.int32, (B2, H4), 1)
    is_g = jnp.logical_and(lane4 >= 2 * H, lane4 < 3 * H)
    sc = jnp.where(is_g, 1.0, 0.5).astype(jnp.float32)   # pre-scale == post-mul
    ad = jnp.where(is_g, 0.0, 0.5).astype(jnp.float32)   # post-add

    # State-placement mask for the block-diagonal recurrence: forward rows
    # keep lanes [0,H) of the padded state, backward rows keep lanes [H,2H).
    row = lax.broadcasted_iota(jnp.int32, (B2, H2), 0)
    lane2 = lax.broadcasted_iota(jnp.int32, (B2, H2), 1)
    keep = (row < B) == (lane2 < H)                                   # (2B, 2H)
    zeros_pad = jnp.zeros((B2, H2), jnp.float32)

    h_pad = zeros_pad                          # (2B, 2H) padded hidden state
    c = jnp.zeros((B2, H), jnp.float32)        # (2B, H)  cell state

    h_fwd = [None] * T
    h_bwd = [None] * T

    # T is small and static: fully unrolled, every index below is static.
    for t in range(T):
        gx_t = gx[t * B2:(t + 1) * B2, :]                             # (2B, 4H)

        # One 128-lane recurrent matmul covers both directions (block-diag).
        r = jnp.dot(h_pad, whh, preferred_element_type=jnp.float32)   # (2B, 4H)
        gates = gx_t + r

        a = jnp.tanh(gates * sc) * sc + ad        # single EUP pass, all gates
        i = a[:, 0 * H:1 * H]
        f = a[:, 1 * H:2 * H]
        g = a[:, 2 * H:3 * H]
        o = a[:, 3 * H:4 * H]
        c = f * c + i * g
        h = o * jnp.tanh(c)                                           # (2B, H)

        # Forward hidden belongs to time t, backward hidden to time T-1-t.
        h_fwd[t] = h[0:B]
        h_bwd[T - 1 - t] = h[B:B2]

        # Re-pad the state for the next block-diagonal recurrent matmul:
        # fwd rows -> lanes [0,H), bwd rows -> lanes [H,2H), zeros elsewhere.
        h_pad = jnp.where(keep, jnp.concatenate([h, h], axis=1), zeros_pad)

    # Register-resident rec = concat([h_fwd, h_bwd], -1) over all time steps.
    rec_f = jnp.concatenate(h_fwd, axis=0)                            # (T*B, H)
    rec_b = jnp.concatenate(h_bwd, axis=0)                            # (T*B, H)
    rec = jnp.concatenate([rec_f, rec_b], axis=1)                     # (T*B, 2H)

    # Final embedding: one MXU matmul into a lane-dense (T*B, 128) output.
    out = jnp.dot(rec, wemb_ref[...],
                  preferred_element_type=jnp.float32) + bemb_ref[...]
    out_ref[...] = out.astype(out_ref.dtype)


# ------------------------------- wrapper ----------------------------------- #
def bidirectional_lstm(x, params):
    """x: (T, B, nIn) float32 -> (T, B, nOut) float32."""
    T, B, nIn = x.shape
    H = params['whh_f'].shape[1]
    nOut = params['wemb'].shape[0]
    assert nOut <= N_PAD

    # All weight transposes / stacking / bias folding happen once here so the
    # kernel sees matmul-ready operands and does zero per-step relayout.
    wih_blk = jnp.concatenate([params['wih_f'].T, params['wih_b'].T], axis=0)  # (2nIn, 4H)
    whh_blk = jnp.concatenate([params['whh_f'].T, params['whh_b'].T], axis=0)  # (2H,   4H)

    bf = (params['bih_f'] + params['bhh_f']).reshape(1, 4 * H)
    bb = (params['bih_b'] + params['bhh_b']).reshape(1, 4 * H)
    b_blk = jnp.tile(
        jnp.concatenate([jnp.broadcast_to(bf, (B, 4 * H)),
                         jnp.broadcast_to(bb, (B, 4 * H))], axis=0),
        (T, 1))                                                                 # (T*2B, 4H)

    # x_blk: per time-block, forward rows see x[t] in cols [0,nIn), backward
    # rows see x[T-1-t] in cols [nIn, 2nIn); zeros elsewhere.
    zeros_x = jnp.zeros_like(x)
    xf = jnp.concatenate([x, zeros_x], axis=-1)                 # (T, B, 2nIn)
    xb = jnp.concatenate([zeros_x, jnp.flip(x, 0)], axis=-1)    # (T, B, 2nIn)
    x_blk = jnp.concatenate([xf, xb], axis=1).reshape(T * 2 * B, 2 * nIn)

    # Lane-dense embedding: zero-pad output lanes to 128, slice afterwards.
    wemb_pad = jnp.zeros((2 * H, N_PAD), jnp.float32).at[:, :nOut].set(params['wemb'].T)
    bemb_pad = jnp.zeros((1, N_PAD), jnp.float32).at[:, :nOut].set(params['bemb'])

    vmem = pl.BlockSpec(memory_space=pltpu.MemorySpace.VMEM)
    kernel = functools.partial(bilstm_kernel, T=T, B=B, H=H)
    out_pad = pl.pallas_call(
        kernel,
        out_shape=jax.ShapeDtypeStruct((T * B, N_PAD), jnp.float32),
        in_specs=[vmem] * 6,
        out_specs=vmem,
    )(x_blk, wih_blk, whh_blk, b_blk, wemb_pad, bemb_pad)
    # Note: for non-trivial B, tile batch with a leading grid axis marked
    # "parallel" (engages v7x's second TensorCore); at B=2 a single program
    # is optimal on all generations.
    return out_pad[:, :nOut].reshape(T, B, nOut)


# --------------------------- pure-JAX reference ----------------------------- #
def _ref_forward(x, params):
    T, B, _ = x.shape
    H = params['whh_f'].shape[1]

    def run_dir(xs, wih, whh, bih, bhh):
        gx = jnp.einsum('tbi,gi->tbg', xs, wih) + (bih + bhh)

        def step(carry, gx_t):
            h, c = carry
            gates = gx_t + h @ whh.T
            i, f, g, o = jnp.split(gates, 4, axis=-1)
            i = jax.nn.sigmoid(i)
            f = jax.nn.sigmoid(f)
            g = jnp.tanh(g)
            o = jax.nn.sigmoid(o)
            c = f * c + i * g
            h = o * jnp.tanh(c)
            return (h, c), h

        z = jnp.zeros((B, H), jnp.float32)
        _, hs = lax.scan(step, (z, z), gx)
        return hs

    hs_f = run_dir(x, params['wih_f'], params['whh_f'],
                   params['bih_f'], params['bhh_f'])
    hs_b = jnp.flip(run_dir(jnp.flip(x, 0), params['wih_b'], params['whh_b'],
                            params['bih_b'], params['bhh_b']), 0)
    rec = jnp.concatenate([hs_f, hs_b], axis=-1)              # (T, B, 2H)
    out = jnp.einsum('tbh,oh->tbo', rec, params['wemb']) + params['bemb']
    return out


# --------------------------------- main ------------------------------------- #
if __name__ == "__main__":
    T, B, nIn, H, nOut = 8, 2, 16, 32, 16

    key = jax.random.PRNGKey(0)
    ks = jax.random.split(key, 12)
    s = 1.0 / jnp.sqrt(H)   # PyTorch-style uniform(-1/sqrt(H), 1/sqrt(H)) init

    def u(k, shape):
        return jax.random.uniform(k, shape, jnp.float32, minval=-s, maxval=s)

    params = dict(
        wih_f=u(ks[0], (4 * H, nIn)), whh_f=u(ks[1], (4 * H, H)),
        bih_f=u(ks[2], (4 * H,)),     bhh_f=u(ks[3], (4 * H,)),
        wih_b=u(ks[4], (4 * H, nIn)), whh_b=u(ks[5], (4 * H, H)),
        bih_b=u(ks[6], (4 * H,)),     bhh_b=u(ks[7], (4 * H,)),
        wemb=u(ks[8], (nOut, 2 * H)), bemb=u(ks[9], (nOut,)),
    )
    x = jax.random.normal(ks[10], (T, B, nIn), jnp.float32)

    out = bidirectional_lstm(x, params)
    out = jax.block_until_ready(out)

    ref = _ref_forward(x, params)
    assert out.shape == (T, B, nOut)
    assert jnp.allclose(out, ref, rtol=1e-5, atol=5e-5), "mismatch vs JAX reference"

    print("KERNEL_OK")
</pallas_src>

<mosaic_0001>
module attributes {stable_mosaic.version = 11 : i64} {
  func.func @bilstm_kernel(%arg0: memref<32x32xf32, #tpu.memory_space<vmem>>, %arg1: memref<32x128xf32, #tpu.memory_space<vmem>>, %arg2: memref<64x128xf32, #tpu.memory_space<vmem>>, %arg3: memref<32x128xf32, #tpu.memory_space<vmem>>, %arg4: memref<64x128xf32, #tpu.memory_space<vmem>>, %arg5: memref<1x128xf32, #tpu.memory_space<vmem>>, %arg6: memref<16x128xf32, #tpu.memory_space<vmem>>) attributes {dimension_semantics = [], scalar_prefetch = 0 : i64, scratch_operands = 0 : i64, tpu.core_type = #tpu.core_type<tc>} {
    %c0 = arith.constant 0 : index
    %c0_0 = arith.constant 0 : index
    %0 = vector.load %arg0[%c0, %c0_0] : memref<32x32xf32, #tpu.memory_space<vmem>>, vector<32x32xf32>
    %c0_1 = arith.constant 0 : index
    %c0_2 = arith.constant 0 : index
    %1 = vector.load %arg1[%c0_1, %c0_2] : memref<32x128xf32, #tpu.memory_space<vmem>>, vector<32x128xf32>
    %cst = arith.constant dense<0.000000e+00> : vector<32x128xf32>
    %2 = tpu.matmul %0, %1, %cst {dimension_numbers = #tpu.dot_dimension_numbers<[1], [0], [0], [1], [0, 0, 1, 1], [], []>} : vector<32x32xf32>, vector<32x128xf32>, vector<32x128xf32> -> vector<32x128xf32>
    %c0_3 = arith.constant 0 : index
    %c0_4 = arith.constant 0 : index
    %3 = vector.load %arg3[%c0_3, %c0_4] : memref<32x128xf32, #tpu.memory_space<vmem>>, vector<32x128xf32>
    %4 = arith.addf %2, %3 : vector<32x128xf32>
    %c0_5 = arith.constant 0 : index
    %c0_6 = arith.constant 0 : index
    %5 = vector.load %arg2[%c0_5, %c0_6] : memref<64x128xf32, #tpu.memory_space<vmem>>, vector<64x128xf32>
    %6 = tpu.iota {dimensions = array<i32: 1>} : vector<4x128xi32>
    %c64_i32 = arith.constant 64 : i32
    %7 = vector.broadcast %c64_i32 : i32 to vector<4x128xi32>
    %8 = arith.cmpi sge, %6, %7 : vector<4x128xi32>
    %c96_i32 = arith.constant 96 : i32
    %9 = vector.broadcast %c96_i32 : i32 to vector<4x128xi32>
    %10 = arith.cmpi slt, %6, %9 : vector<4x128xi32>
    %11 = arith.andi %8, %10 : vector<4x128xi1>
    %cst_7 = arith.constant 1.000000e+00 : f32
    %cst_8 = arith.constant 5.000000e-01 : f32
    %12 = vector.broadcast %cst_7 : f32 to vector<4x128xf32>
    %13 = vector.broadcast %cst_8 : f32 to vector<4x128xf32>
    %14 = arith.select %11, %12, %13 : vector<4x128xi1>, vector<4x128xf32>
    %cst_9 = arith.constant 0.000000e+00 : f32
    %cst_10 = arith.constant 5.000000e-01 : f32
    %15 = vector.broadcast %cst_9 : f32 to vector<4x128xf32>
    %16 = vector.broadcast %cst_10 : f32 to vector<4x128xf32>
    %17 = arith.select %11, %15, %16 : vector<4x128xi1>, vector<4x128xf32>
    %18 = tpu.iota {dimensions = array<i32: 0>} : vector<4x64xi32>
    %19 = tpu.iota {dimensions = array<i32: 1>} : vector<4x64xi32>
    %c2_i32 = arith.constant 2 : i32
    %20 = vector.broadcast %c2_i32 : i32 to vector<4x64xi32>
    %21 = arith.cmpi slt, %18, %20 : vector<4x64xi32>
    %c32_i32 = arith.constant 32 : i32
    %22 = vector.broadcast %c32_i32 : i32 to vector<4x64xi32>
    %23 = arith.cmpi slt, %19, %22 : vector<4x64xi32>
    %24 = arith.xori %21, %23 : vector<4x64xi1>
    %cst_11 = arith.constant dense<true> : vector<4x64xi1>
    %25 = arith.xori %24, %cst_11 : vector<4x64xi1>
    %cst_12 = arith.constant 0.000000e+00 : f32
    %26 = vector.broadcast %cst_12 : f32 to vector<4x64xf32>
    %cst_13 = arith.constant 0.000000e+00 : f32
    %27 = vector.broadcast %cst_13 : f32 to vector<4x32xf32>
    %28 = vector.extract_strided_slice %4 {offsets = [0, 0], sizes = [4, 128], strides = [1, 1]} : vector<32x128xf32> to vector<4x128xf32>
    %cst_14 = arith.constant dense<0.000000e+00> : vector<4x128xf32>
    %29 = tpu.matmul %26, %5, %cst_14 {dimension_numbers = #tpu.dot_dimension_numbers<[1], [0], [0], [1], [0, 0, 1, 1], [], []>} : vector<4x64xf32>, vector<64x128xf32>, vector<4x128xf32> -> vector<4x128xf32>
    %30 = arith.addf %28, %29 : vector<4x128xf32>
    %31 = arith.mulf %30, %14 : vector<4x128xf32>
    %32 = math.tanh %31 : vector<4x128xf32>
    %33 = arith.mulf %32, %14 : vector<4x128xf32>
    %34 = arith.addf %33, %17 : vector<4x128xf32>
    %35 = vector.extract_strided_slice %34 {offsets = [0, 0], sizes = [4, 32], strides = [1, 1]} : vector<4x128xf32> to vector<4x32xf32>
    %36 = vector.extract_strided_slice %34 {offsets = [0, 32], sizes = [4, 32], strides = [1, 1]} : vector<4x128xf32> to vector<4x32xf32>
    %37 = vector.extract_strided_slice %34 {offsets = [0, 64], sizes = [4, 32], strides = [1, 1]} : vector<4x128xf32> to vector<4x32xf32>
    %38 = vector.extract_strided_slice %34 {offsets = [0, 96], sizes = [4, 32], strides = [1, 1]} : vector<4x128xf32> to vector<4x32xf32>
    %39 = arith.mulf %36, %27 : vector<4x32xf32>
    %40 = arith.mulf %35, %37 : vector<4x32xf32>
    %41 = arith.addf %39, %40 : vector<4x32xf32>
    %42 = math.tanh %41 : vector<4x32xf32>
    %43 = arith.mulf %38, %42 : vector<4x32xf32>
    %44 = vector.extract_strided_slice %43 {offsets = [0, 0], sizes = [2, 32], strides = [1, 1]} : vector<4x32xf32> to vector<2x32xf32>
    %45 = vector.extract_strided_slice %43 {offsets = [2, 0], sizes = [2, 32], strides = [1, 1]} : vector<4x32xf32> to vector<2x32xf32>
    %46 = tpu.concatenate %43, %43 in 1 : vector<4x32xf32>, vector<4x32xf32> -> vector<4x64xf32>
    %47 = arith.select %25, %46, %26 : vector<4x64xi1>, vector<4x64xf32>
    %48 = vector.extract_strided_slice %4 {offsets = [4, 0], sizes = [4, 128], strides = [1, 1]} : vector<32x128xf32> to vector<4x128xf32>
    %cst_15 = arith.constant dense<0.000000e+00> : vector<4x128xf32>
    %49 = tpu.matmul %47, %5, %cst_15 {dimension_numbers = #tpu.dot_dimension_numbers<[1], [0], [0], [1], [0, 0, 1, 1], [], []>} : vector<4x64xf32>, vector<64x128xf32>, vector<4x128xf32> -> vector<4x128xf32>
    %50 = arith.addf %48, %49 : vector<4x128xf32>
    %51 = arith.mulf %50, %14 : vector<4x128xf32>
    %52 = math.tanh %51 : vector<4x128xf32>
    %53 = arith.mulf %52, %14 : vector<4x128xf32>
    %54 = arith.addf %53, %17 : vector<4x128xf32>
    %55 = vector.extract_strided_slice %54 {offsets = [0, 0], sizes = [4, 32], strides = [1, 1]} : vector<4x128xf32> to vector<4x32xf32>
    %56 = vector.extract_strided_slice %54 {offsets = [0, 32], sizes = [4, 32], strides = [1, 1]} : vector<4x128xf32> to vector<4x32xf32>
    %57 = vector.extract_strided_slice %54 {offsets = [0, 64], sizes = [4, 32], strides = [1, 1]} : vector<4x128xf32> to vector<4x32xf32>
    %58 = vector.extract_strided_slice %54 {offsets = [0, 96], sizes = [4, 32], strides = [1, 1]} : vector<4x128xf32> to vector<4x32xf32>
    %59 = arith.mulf %56, %41 : vector<4x32xf32>
    %60 = arith.mulf %55, %57 : vector<4x32xf32>
    %61 = arith.addf %59, %60 : vector<4x32xf32>
    %62 = math.tanh %61 : vector<4x32xf32>
    %63 = arith.mulf %58, %62 : vector<4x32xf32>
    %64 = vector.extract_strided_slice %63 {offsets = [0, 0], sizes = [2, 32], strides = [1, 1]} : vector<4x32xf32> to vector<2x32xf32>
    %65 = vector.extract_strided_slice %63 {offsets = [2, 0], sizes = [2, 32], strides = [1, 1]} : vector<4x32xf32> to vector<2x32xf32>
    %66 = tpu.concatenate %63, %63 in 1 : vector<4x32xf32>, vector<4x32xf32> -> vector<4x64xf32>
    %67 = arith.select %25, %66, %26 : vector<4x64xi1>, vector<4x64xf32>
    %68 = vector.extract_strided_slice %4 {offsets = [8, 0], sizes = [4, 128], strides = [1, 1]} : vector<32x128xf32> to vector<4x128xf32>
    %cst_16 = arith.constant dense<0.000000e+00> : vector<4x128xf32>
    %69 = tpu.matmul %67, %5, %cst_16 {dimension_numbers = #tpu.dot_dimension_numbers<[1], [0], [0], [1], [0, 0, 1, 1], [], []>} : vector<4x64xf32>, vector<64x128xf32>, vector<4x128xf32> -> vector<4x128xf32>
    %70 = arith.addf %68, %69 : vector<4x128xf32>
    %71 = arith.mulf %70, %14 : vector<4x128xf32>
    %72 = math.tanh %71 : vector<4x128xf32>
    %73 = arith.mulf %72, %14 : vector<4x128xf32>
    %74 = arith.addf %73, %17 : vector<4x128xf32>
    %75 = vector.extract_strided_slice %74 {offsets = [0, 0], sizes = [4, 32], strides = [1, 1]} : vector<4x128xf32> to vector<4x32xf32>
    %76 = vector.extract_strided_slice %74 {offsets = [0, 32], sizes = [4, 32], strides = [1, 1]} : vector<4x128xf32> to vector<4x32xf32>
    %77 = vector.extract_strided_slice %74 {offsets = [0, 64], sizes = [4, 32], strides = [1, 1]} : vector<4x128xf32> to vector<4x32xf32>
    %78 = vector.extract_strided_slice %74 {offsets = [0, 96], sizes = [4, 32], strides = [1, 1]} : vector<4x128xf32> to vector<4x32xf32>
    %79 = arith.mulf %76, %61 : vector<4x32xf32>
    %80 = arith.mulf %75, %77 : vector<4x32xf32>
    %81 = arith.addf %79, %80 : vector<4x32xf32>
    %82 = math.tanh %81 : vector<4x32xf32>
    %83 = arith.mulf %78, %82 : vector<4x32xf32>
    %84 = vector.extract_strided_slice %83 {offsets = [0, 0], sizes = [2, 32], strides = [1, 1]} : vector<4x32xf32> to vector<2x32xf32>
    %85 = vector.extract_strided_slice %83 {offsets = [2, 0], sizes = [2, 32], strides = [1, 1]} : vector<4x32xf32> to vector<2x32xf32>
    %86 = tpu.concatenate %83, %83 in 1 : vector<4x32xf32>, vector<4x32xf32> -> vector<4x64xf32>
    %87 = arith.select %25, %86, %26 : vector<4x64xi1>, vector<4x64xf32>
    %88 = vector.extract_strided_slice %4 {offsets = [12, 0], sizes = [4, 128], strides = [1, 1]} : vector<32x128xf32> to vector<4x128xf32>
    %cst_17 = arith.constant dense<0.000000e+00> : vector<4x128xf32>
    %89 = tpu.matmul %87, %5, %cst_17 {dimension_numbers = #tpu.dot_dimension_numbers<[1], [0], [0], [1], [0, 0, 1, 1], [], []>} : vector<4x64xf32>, vector<64x128xf32>, vector<4x128xf32> -> vector<4x128xf32>
    %90 = arith.addf %88, %89 : vector<4x128xf32>
    %91 = arith.mulf %90, %14 : vector<4x128xf32>
    %92 = math.tanh %91 : vector<4x128xf32>
    %93 = arith.mulf %92, %14 : vector<4x128xf32>
    %94 = arith.addf %93, %17 : vector<4x128xf32>
    %95 = vector.extract_strided_slice %94 {offsets = [0, 0], sizes = [4, 32], strides = [1, 1]} : vector<4x128xf32> to vector<4x32xf32>
    %96 = vector.extract_strided_slice %94 {offsets = [0, 32], sizes = [4, 32], strides = [1, 1]} : vector<4x128xf32> to vector<4x32xf32>
    %97 = vector.extract_strided_slice %94 {offsets = [0, 64], sizes = [4, 32], strides = [1, 1]} : vector<4x128xf32> to vector<4x32xf32>
    %98 = vector.extract_strided_slice %94 {offsets = [0, 96], sizes = [4, 32], strides = [1, 1]} : vector<4x128xf32> to vector<4x32xf32>
    %99 = arith.mulf %96, %81 : vector<4x32xf32>
    %100 = arith.mulf %95, %97 : vector<4x32xf32>
    %101 = arith.addf %99, %100 : vector<4x32xf32>
    %102 = math.tanh %101 : vector<4x32xf32>
    %103 = arith.mulf %98, %102 : vector<4x32xf32>
    %104 = vector.extract_strided_slice %103 {offsets = [0, 0], sizes = [2, 32], strides = [1, 1]} : vector<4x32xf32> to vector<2x32xf32>
    %105 = vector.extract_strided_slice %103 {offsets = [2, 0], sizes = [2, 32], strides = [1, 1]} : vector<4x32xf32> to vector<2x32xf32>
    %106 = tpu.concatenate %103, %103 in 1 : vector<4x32xf32>, vector<4x32xf32> -> vector<4x64xf32>
    %107 = arith.select %25, %106, %26 : vector<4x64xi1>, vector<4x64xf32>
    %108 = vector.extract_strided_slice %4 {offsets = [16, 0], sizes = [4, 128], strides = [1, 1]} : vector<32x128xf32> to vector<4x128xf32>
    %cst_18 = arith.constant dense<0.000000e+00> : vector<4x128xf32>
    %109 = tpu.matmul %107, %5, %cst_18 {dimension_numbers = #tpu.dot_dimension_numbers<[1], [0], [0], [1], [0, 0, 1, 1], [], []>} : vector<4x64xf32>, vector<64x128xf32>, vector<4x128xf32> -> vector<4x128xf32>
    %110 = arith.addf %108, %109 : vector<4x128xf32>
    %111 = arith.mulf %110, %14 : vector<4x128xf32>
    %112 = math.tanh %111 : vector<4x128xf32>
    %113 = arith.mulf %112, %14 : vector<4x128xf32>
    %114 = arith.addf %113, %17 : vector<4x128xf32>
    %115 = vector.extract_strided_slice %114 {offsets = [0, 0], sizes = [4, 32], strides = [1, 1]} : vector<4x128xf32> to vector<4x32xf32>
    %116 = vector.extract_strided_slice %114 {offsets = [0, 32], sizes = [4, 32], strides = [1, 1]} : vector<4x128xf32> to vector<4x32xf32>
    %117 = vector.extract_strided_slice %114 {offsets = [0, 64], sizes = [4, 32], strides = [1, 1]} : vector<4x128xf32> to vector<4x32xf32>
    %118 = vector.extract_strided_slice %114 {offsets = [0, 96], sizes = [4, 32], strides = [1, 1]} : vector<4x128xf32> to vector<4x32xf32>
    %119 = arith.mulf %116, %101 : vector<4x32xf32>
    %120 = arith.mulf %115, %117 : vector<4x32xf32>
    %121 = arith.addf %119, %120 : vector<4x32xf32>
    %122 = math.tanh %121 : vector<4x32xf32>
    %123 = arith.mulf %118, %122 : vector<4x32xf32>
    %124 = vector.extract_strided_slice %123 {offsets = [0, 0], sizes = [2, 32], strides = [1, 1]} : vector<4x32xf32> to vector<2x32xf32>
    %125 = vector.extract_strided_slice %123 {offsets = [2, 0], sizes = [2, 32], strides = [1, 1]} : vector<4x32xf32> to vector<2x32xf32>
    %126 = tpu.concatenate %123, %123 in 1 : vector<4x32xf32>, vector<4x32xf32> -> vector<4x64xf32>
    %127 = arith.select %25, %126, %26 : vector<4x64xi1>, vector<4x64xf32>
    %128 = vector.extract_strided_slice %4 {offsets = [20, 0], sizes = [4, 128], strides = [1, 1]} : vector<32x128xf32> to vector<4x128xf32>
    %cst_19 = arith.constant dense<0.000000e+00> : vector<4x128xf32>
    %129 = tpu.matmul %127, %5, %cst_19 {dimension_numbers = #tpu.dot_dimension_numbers<[1], [0], [0], [1], [0, 0, 1, 1], [], []>} : vector<4x64xf32>, vector<64x128xf32>, vector<4x128xf32> -> vector<4x128xf32>
    %130 = arith.addf %128, %129 : vector<4x128xf32>
    %131 = arith.mulf %130, %14 : vector<4x128xf32>
    %132 = math.tanh %131 : vector<4x128xf32>
    %133 = arith.mulf %132, %14 : vector<4x128xf32>
    %134 = arith.addf %133, %17 : vector<4x128xf32>
    %135 = vector.extract_strided_slice %134 {offsets = [0, 0], sizes = [4, 32], strides = [1, 1]} : vector<4x128xf32> to vector<4x32xf32>
    %136 = vector.extract_strided_slice %134 {offsets = [0, 32], sizes = [4, 32], strides = [1, 1]} : vector<4x128xf32> to vector<4x32xf32>
    %137 = vector.extract_strided_slice %134 {offsets = [0, 64], sizes = [4, 32], strides = [1, 1]} : vector<4x128xf32> to vector<4x32xf32>
    %138 = vector.extract_strided_slice %134 {offsets = [0, 96], sizes = [4, 32], strides = [1, 1]} : vector<4x128xf32> to vector<4x32xf32>
    %139 = arith.mulf %136, %121 : vector<4x32xf32>
    %140 = arith.mulf %135, %137 : vector<4x32xf32>
    %141 = arith.addf %139, %140 : vector<4x32xf32>
    %142 = math.tanh %141 : vector<4x32xf32>
    %143 = arith.mulf %138, %142 : vector<4x32xf32>
    %144 = vector.extract_strided_slice %143 {offsets = [0, 0], sizes = [2, 32], strides = [1, 1]} : vector<4x32xf32> to vector<2x32xf32>
    %145 = vector.extract_strided_slice %143 {offsets = [2, 0], sizes = [2, 32], strides = [1, 1]} : vector<4x32xf32> to vector<2x32xf32>
    %146 = tpu.concatenate %143, %143 in 1 : vector<4x32xf32>, vector<4x32xf32> -> vector<4x64xf32>
    %147 = arith.select %25, %146, %26 : vector<4x64xi1>, vector<4x64xf32>
    %148 = vector.extract_strided_slice %4 {offsets = [24, 0], sizes = [4, 128], strides = [1, 1]} : vector<32x128xf32> to vector<4x128xf32>
    %cst_20 = arith.constant dense<0.000000e+00> : vector<4x128xf32>
    %149 = tpu.matmul %147, %5, %cst_20 {dimension_numbers = #tpu.dot_dimension_numbers<[1], [0], [0], [1], [0, 0, 1, 1], [], []>} : vector<4x64xf32>, vector<64x128xf32>, vector<4x128xf32> -> vector<4x128xf32>
    %150 = arith.addf %148, %149 : vector<4x128xf32>
    %151 = arith.mulf %150, %14 : vector<4x128xf32>
    %152 = math.tanh %151 : vector<4x128xf32>
    %153 = arith.mulf %152, %14 : vector<4x128xf32>
    %154 = arith.addf %153, %17 : vector<4x128xf32>
    %155 = vector.extract_strided_slice %154 {offsets = [0, 0], sizes = [4, 32], strides = [1, 1]} : vector<4x128xf32> to vector<4x32xf32>
    %156 = vector.extract_strided_slice %154 {offsets = [0, 32], sizes = [4, 32], strides = [1, 1]} : vector<4x128xf32> to vector<4x32xf32>
    %157 = vector.extract_strided_slice %154 {offsets = [0, 64], sizes = [4, 32], strides = [1, 1]} : vector<4x128xf32> to vector<4x32xf32>
    %158 = vector.extract_strided_slice %154 {offsets = [0, 96], sizes = [4, 32], strides = [1, 1]} : vector<4x128xf32> to vector<4x32xf32>
    %159 = arith.mulf %156, %141 : vector<4x32xf32>
    %160 = arith.mulf %155, %157 : vector<4x32xf32>
    %161 = arith.addf %159, %160 : vector<4x32xf32>
    %162 = math.tanh %161 : vector<4x32xf32>
    %163 = arith.mulf %158, %162 : vector<4x32xf32>
    %164 = vector.extract_strided_slice %163 {offsets = [0, 0], sizes = [2, 32], strides = [1, 1]} : vector<4x32xf32> to vector<2x32xf32>
    %165 = vector.extract_strided_slice %163 {offsets = [2, 0], sizes = [2, 32], strides = [1, 1]} : vector<4x32xf32> to vector<2x32xf32>
    %166 = tpu.concatenate %163, %163 in 1 : vector<4x32xf32>, vector<4x32xf32> -> vector<4x64xf32>
    %167 = arith.select %25, %166, %26 : vector<4x64xi1>, vector<4x64xf32>
    %168 = vector.extract_strided_slice %4 {offsets = [28, 0], sizes = [4, 128], strides = [1, 1]} : vector<32x128xf32> to vector<4x128xf32>
    %cst_21 = arith.constant dense<0.000000e+00> : vector<4x128xf32>
    %169 = tpu.matmul %167, %5, %cst_21 {dimension_numbers = #tpu.dot_dimension_numbers<[1], [0], [0], [1], [0, 0, 1, 1], [], []>} : vector<4x64xf32>, vector<64x128xf32>, vector<4x128xf32> -> vector<4x128xf32>
    %170 = arith.addf %168, %169 : vector<4x128xf32>
    %171 = arith.mulf %170, %14 : vector<4x128xf32>
    %172 = math.tanh %171 : vector<4x128xf32>
    %173 = arith.mulf %172, %14 : vector<4x128xf32>
    %174 = arith.addf %173, %17 : vector<4x128xf32>
    %175 = vector.extract_strided_slice %174 {offsets = [0, 0], sizes = [4, 32], strides = [1, 1]} : vector<4x128xf32> to vector<4x32xf32>
    %176 = vector.extract_strided_slice %174 {offsets = [0, 32], sizes = [4, 32], strides = [1, 1]} : vector<4x128xf32> to vector<4x32xf32>
    %177 = vector.extract_strided_slice %174 {offsets = [0, 64], sizes = [4, 32], strides = [1, 1]} : vector<4x128xf32> to vector<4x32xf32>
    %178 = vector.extract_strided_slice %174 {offsets = [0, 96], sizes = [4, 32], strides = [1, 1]} : vector<4x128xf32> to vector<4x32xf32>
    %179 = arith.mulf %176, %161 : vector<4x32xf32>
    %180 = arith.mulf %175, %177 : vector<4x32xf32>
    %181 = arith.addf %179, %180 : vector<4x32xf32>
    %182 = math.tanh %181 : vector<4x32xf32>
    %183 = arith.mulf %178, %182 : vector<4x32xf32>
    %184 = vector.extract_strided_slice %183 {offsets = [0, 0], sizes = [2, 32], strides = [1, 1]} : vector<4x32xf32> to vector<2x32xf32>
    %185 = vector.extract_strided_slice %183 {offsets = [2, 0], sizes = [2, 32], strides = [1, 1]} : vector<4x32xf32> to vector<2x32xf32>
    %186 = tpu.concatenate %44, %64, %84, %104, %124, %144, %164, %184 in 0 : vector<2x32xf32>, vector<2x32xf32>, vector<2x32xf32>, vector<2x32xf32>, vector<2x32xf32>, vector<2x32xf32>, vector<2x32xf32>, vector<2x32xf32> -> vector<16x32xf32>
    %187 = tpu.concatenate %185, %165, %145, %125, %105, %85, %65, %45 in 0 : vector<2x32xf32>, vector<2x32xf32>, vector<2x32xf32>, vector<2x32xf32>, vector<2x32xf32>, vector<2x32xf32>, vector<2x32xf32>, vector<2x32xf32> -> vector<16x32xf32>
    %188 = tpu.concatenate %186, %187 in 1 : vector<16x32xf32>, vector<16x32xf32> -> vector<16x64xf32>
    %c0_22 = arith.constant 0 : index
    %c0_23 = arith.constant 0 : index
    %189 = vector.load %arg4[%c0_22, %c0_23] : memref<64x128xf32, #tpu.memory_space<vmem>>, vector<64x128xf32>
    %cst_24 = arith.constant dense<0.000000e+00> : vector<16x128xf32>
    %190 = tpu.matmul %188, %189, %cst_24 {dimension_numbers = #tpu.dot_dimension_numbers<[1], [0], [0], [1], [0, 0, 1, 1], [], []>} : vector<16x64xf32>, vector<64x128xf32>, vector<16x128xf32> -> vector<16x128xf32>
    %c0_25 = arith.constant 0 : index
    %c0_26 = arith.constant 0 : index
    %191 = vector.load %arg5[%c0_25, %c0_26] : memref<1x128xf32, #tpu.memory_space<vmem>>, vector<1x128xf32>
    %192 = vector.broadcast %191 : vector<1x128xf32> to vector<16x128xf32>
    %193 = arith.addf %190, %192 : vector<16x128xf32>
    %c0_27 = arith.constant 0 : index
    %c0_28 = arith.constant 0 : index
    %194 = vector.load %arg6[%c0_27, %c0_28] : memref<16x128xf32, #tpu.memory_space<vmem>>, vector<16x128xf32>
    tpu.vector_store %arg6[%c0_27, %c0_28], %193 {strides = array<i32>} : memref<16x128xf32, #tpu.memory_space<vmem>>, vector<16x128xf32>,
    return
  }
}

</mosaic_0001>

<bundles_post_ra>
// kernel: tpu_custom_call.1
= control target key start
LH: loop header
LB: loop body
LE: loop exit
PB: predicated region body
PF: predicated region fallthrough
CT: control target
= control target key end

     0   :  { %11 = vsyncpa [#allocation3], 0  ;;  %s1285_s0 = inlined_call_operand.hbm [shape: f32[32,32], index: 0, kind: input, shape index: {}]   ;;  %s1286_s1 = inlined_call_operand.hbm [shape: f32[32,128], index: 1, kind: input, shape index: {}]   ;;  %s1287_s2 = inlined_call_operand.hbm [shape: f32[64,128], index: 2, kind: input, shape index: {}]   ;;  %s1288_s3 = inlined_call_operand.hbm [shape: f32[32,128], index: 3, kind: input, shape index: {}]   ;;  %s1289_s4 = inlined_call_operand.hbm [shape: f32[64,128], index: 4, kind: input, shape index: {}]   ;;  %s1290_s5 = inlined_call_operand.vmem [shape: f32[1,128], index: 5, kind: input, shape index: {}]   ;;  %s1291_s6 = inlined_call_operand.hbm [shape: f32[16,128], index: 6, kind: output, shape index: {}]  }
   0x1   :  { %12 = vsyncpa [#allocation6], 0 }
   0x2   :  { %13 = vsyncpa [#allocation9], 0 }
   0x3   :  { %14 = vsyncpa [#allocation4], 0  ;;  %s32_s23 = sshll.u32 %s1286_s1, 4  ;;  %s968_s24 = smov [#allocation5]   ;;  %s33_s23 = int_to_ptr.hbm [resolvable:$true] %s32_s23 }
   0x4   :  { %s34_s25 = sshll.u32 %s968_s24, 4  ;;  %s58_s28 = sshll.u32 %s1288_s3, 4  ;;  %s35_s25 = int_to_ptr.vmem [resolvable:$true] %s34_s25  ;;  %s59_s28 = int_to_ptr.hbm [resolvable:$true] %s58_s28 }
   0x5   :  { %s969_s29 = smov 128   ;;  %s970_s30 = smov 8  }
   0x6   :  { %40 = dma.hbm_to_vmem [thread:$0]  %s33_s23, 512, %s35_s25, [#allocation6], %s969_s29, %s969_s29, %s970_s30  }
   0x7   :  { %s971_s7 = smov [#allocation8]   ;;  %s19_s1 = sshll.u32 %s1285_s0, 4  ;;  %s20_s1 = int_to_ptr.hbm [resolvable:$true] %s19_s1 }
   0x8   :  { %s60_s8 = sshll.u32 %s971_s7, 4  ;;  %s45_s12 = sshll.u32 %s1287_s2, 4  ;;  %s61_s8 = int_to_ptr.vmem [resolvable:$true] %s60_s8  ;;  %s46_s12 = int_to_ptr.hbm [resolvable:$true] %s45_s12 }
   0x9   :  { %66 = dma.hbm_to_vmem [thread:$0]  %s59_s28, 512, %s61_s8, [#allocation9], %s969_s29, %s969_s29, %s970_s30  }
   0xa   :  { %s972_s13 = smov [#allocation2]   ;;  %s973_s15 = smov [#allocation7]  }
   0xb   :  { %s21_s14 = sshll.u32 %s972_s13, 4  ;;  %s47_s0 = sshll.u32 %s973_s15, 4  ;;  %s22_s14 = int_to_ptr.vmem [resolvable:$true] %s21_s14  ;;  %s48_s0 = int_to_ptr.vmem [resolvable:$true] %s47_s0 }
   0xc   :  { %27 = dma.hbm_to_vmem [thread:$0]  %s20_s1, 512, %s22_s14, [#allocation3], %s969_s29, %s969_s29, %s970_s30  }
   0xd   :  { %s71_s18 = sshll.u32 %s1289_s4, 4  ;;  %s974_s2 = smov [#allocation10]   ;;  %s72_s18 = int_to_ptr.hbm [resolvable:$true] %s71_s18 }
   0xe   :  { %53 = dma.hbm_to_vmem [thread:$0]  %s46_s12, 1024, %s48_s0, [#allocation6], %s969_s29, %s969_s29, %s970_s30  }
   0xf   :  { %s73_s19 = sshll.u32 %s974_s2, 4  ;;  %s74_s19 = int_to_ptr.vmem [resolvable:$true] %s73_s19 }
  0x10   :  { %79 = dma.hbm_to_vmem [thread:$0]  %s72_s18, 1024, %s74_s19, [#allocation9], %s969_s29, %s969_s29, %s970_s30  }
  0x11   :  { %960 = dma.done.wait [#allocation3], 512  }
  0x12   :  { %961 = vsyncadd [#allocation3], 4294966784 }
  0x13   :  { %962 = dma.done.wait [#allocation6], 1536  }
  0x14   :  { %963 = vsyncadd [#allocation6], 4294965760 }
  0x15   :  { %964 = dma.done.wait [#allocation9], 1536  }
  0x16   :  { %965 = vsyncadd [#allocation9], 4294965760  ;;  %v1046_v0 = vld [vmem:[#allocation7 + $0x38] sm:$0xff]  ;;  %v1048_v1 = vld [vmem:[#allocation7 + $0x30] sm:$0xff]  ;;  %vm114_vm0 = vcmask 261120   ;;  %v975_v13 = vmov 0.0   ;;  %v164_v14 = vlaneseq }
  0x17   :  { %189 = vmatpush.msra.mxu1 %v1046_v0  ;;  %v109_v2 = vld [vmem:[#allocation5 + $0x18] sm:$0xff]  ;;  %v108_v3 = vld [vmem:[#allocation5 + $0x10] sm:$0xff]  ;;  %243 = vmatpush.msra.mxu3 %v1046_v0  ;;  %v1052_v4 = vld [vmem:[#allocation7 + $0x28] sm:$0xff]  ;;  %v976_v19 = vmov 0.5   ;;  %s977_s4 = smov 64   ;;  %s978_s20 = smov 32  }
  0x18   :  { %139 = vmatpush.msra.mxu0 %v109_v2  ;;  %426 = vmatpush.msra.mxu2 %v1046_v0  ;;  %v107_v5 = vld [vmem:[#allocation5 + $0x8] sm:$0xff]  ;;  %v1057_v6 = vld [vmem:[#allocation7 + $0x20] sm:$0xff]  ;;  %v1062_v8 = vld [vmem:[#allocation7 + $0x18] sm:$0xff]  ;;  %v165_v15 = vand.u32 127, %v164_v14  ;;  %v172_v36 = vshrl.u32 %v164_v14, 7  ;;  %vm979_vm7 = vmmov 1  }
  0x19   :  { %190 = vmatpush.msra.mxu1 %v1048_v1  ;;  %244 = vmatpush.msra.mxu3 %v1048_v1  ;;  %v106_v7 = vld [vmem:[#allocation5] sm:$0xff]  ;;  %v1067_v10 = vld [vmem:[#allocation7 + $0x10] sm:$0xff]  ;;  %v1072_v11 = vld [vmem:[#allocation7 + $0x8] sm:$0xff]  ;;  %vm177_vm9 = vcmask 523264   ;;  %vm656_vm10 = vcmask 1041408   ;;  %vm658_vm11 = vcmask 1043456  }
  0x1a   :  { %140 = vmatpush.msra.mxu0 %v108_v3  ;;  %427 = vmatpush.msra.mxu2 %v1048_v1  ;;  %v102_v9 = vld [vmem:[#allocation2] sm:$0xff]  ;;  %vm166_vm1 = vcmp.ge.s32.totalorder %v165_v15, 64  ;;  %vm167_vm2 = vcmp.lt.s32.totalorder %v165_v15, 96  ;;  %vm173_vm4 = vcmp.lt.s32.totalorder %v172_v36, 2  ;;  %vm174_vm5 = vcmp.lt.s32.totalorder %v165_v15, 32  ;;  %v103_v58 = vld [vmem:[#allocation2 + $0x8] sm:$0xff] }
  0x1b   :  { %191 = vmatpush.msra.mxu1 %v1052_v4  ;;  %245 = vmatpush.msra.mxu3 %v1052_v4  ;;  %v1078_v12 = vld [vmem:[#allocation7] sm:$0xff]  ;;  %vm168_vm3 = vmand %vm166_vm1, %vm167_vm2  ;;  %vm660_vm12 = vcmask 1045504   ;;  %s980_s23 = smov [#allocation11]   ;;  %s742_s27 = sshll.u32 %s1291_s6, 4  ;;  %s743_s27 = int_to_ptr.hbm [resolvable:$true] %s742_s27 }
  0x1c   :  { %141 = vmatpush.msra.mxu0 %v107_v5  ;;  %428 = vmatpush.msra.mxu2 %v1052_v4  ;;  %v110_v16 = vld [vmem:[#allocation8] sm:$0xff]  ;;  %v1119_v20 = vsel %vm168_vm3, 1.0, %v976_v19  ;;  %v1122_v25 = vsel %vm168_vm3, 0.0, %v976_v19  ;;  %vm175_vm6 = vmxor %vm173_vm4, %vm174_vm5  ;;  %s740_s24 = sshll.u32 %s980_s23, 4  ;;  %s741_s24 = int_to_ptr.vmem [resolvable:$true] %s740_s24 }
  0x1d   :  { %192 = vmatpush.msra.mxu1 %v1057_v6  ;;  %246 = vmatpush.msra.mxu3 %v1057_v6  ;;  %vm1135_vm8 = vmxor %vm175_vm6, %vm979_vm7 }
  0x1e   :  { %142 = vmatpush.msra.mxu0 %v106_v7  ;;  %429 = vmatpush.msra.mxu2 %v1057_v6 }
  0x1f   :  { %193 = vmatpush.msra.mxu1 %v1062_v8  ;;  %757 = vmatmul.msk.f32.vlgmr.msra.gmra.mxu0 %vm114_vm0, %v102_v9 }
  0x20   :  { %247 = vmatpush.msra.mxu3 %v1062_v8  ;;  %430 = vmatpush.msra.mxu2 %v1062_v8 }
  0x21   :  { %194 = vmatpush.msra.mxu1 %v1067_v10  ;;  %546 = vmatpush.msrb.mxu0 %v1046_v0 }
  0x22   :  { %248 = vmatpush.msra.mxu3 %v1067_v10  ;;  %431 = vmatpush.msra.mxu2 %v1067_v10 }
  0x23   :  { %195 = vmatpush.msra.mxu1 %v1072_v11  ;;  %547 = vmatpush.msrb.mxu0 %v1048_v1 }
  0x24   :  { %249 = vmatpush.msra.mxu3 %v1072_v11  ;;  %432 = vmatpush.msra.mxu2 %v1072_v11 }
  0x25   :  { %196 = vmatpush.msra.mxu1 %v1078_v12  ;;  %548 = vmatpush.msrb.mxu0 %v1052_v4 }
  0x26   :  { %197 = vmatmul.f32.vlgmr.msra.gmra.mxu1 %v975_v13  ;;  %250 = vmatpush.msra.mxu3 %v1078_v12 }
  0x27   :  { %363 = vmatpush.msrb.mxu1 %v1046_v0  ;;  %433 = vmatpush.msra.mxu2 %v1078_v12 }
  0x28   :  { %306 = vmatpush.msrb.mxu3 %v1046_v0  ;;  %549 = vmatpush.msrb.mxu0 %v1057_v6 }
  0x29   :  { %364 = vmatpush.msrb.mxu1 %v1048_v1  ;;  %758 = vmatmul.msk.f32.gmra.mxu0 %vm114_vm0, %v103_v58 }
  0x2a   :  { %307 = vmatpush.msrb.mxu3 %v1048_v1  ;;  %550 = vmatpush.msrb.mxu0 %v1062_v8 }
  0x2b   :  { %365 = vmatpush.msrb.mxu1 %v1052_v4 }
  0x2c   :  { %308 = vmatpush.msrb.mxu3 %v1052_v4  ;;  %551 = vmatpush.msrb.mxu0 %v1067_v10 }
  0x2d   :  { %366 = vmatpush.msrb.mxu1 %v1057_v6 }
  0x2e   :  { %309 = vmatpush.msrb.mxu3 %v1057_v6  ;;  %552 = vmatpush.msrb.mxu0 %v1072_v11 }
  0x2f   :  { %367 = vmatpush.msrb.mxu1 %v1062_v8 }
  0x30   :  { %310 = vmatpush.msrb.mxu3 %v1062_v8  ;;  %553 = vmatpush.msrb.mxu0 %v1078_v12 }
  0x31   :  { %368 = vmatpush.msrb.mxu1 %v1067_v10 }
  0x32   :  { %311 = vmatpush.msrb.mxu3 %v1067_v10 }
  0x33   :  { %369 = vmatpush.msrb.mxu1 %v1072_v11 }
  0x34   :  { %312 = vmatpush.msrb.mxu3 %v1072_v11 }
  0x35   :  { %370 = vmatpush.msrb.mxu1 %v1078_v12 }
  0x36   :  { %313 = vmatpush.msrb.mxu3 %v1078_v12 }
  0x37   :  { %603 = vmatpush.msra.mxu1 %v1046_v0 }
  0x39   :  { %604 = vmatpush.msra.mxu1 %v1048_v1 }
  0x3b   :  { %605 = vmatpush.msra.mxu1 %v1052_v4 }
  0x3d   :  { %606 = vmatpush.msra.mxu1 %v1057_v6 }
  0x3f   :  { %607 = vmatpush.msra.mxu1 %v1062_v8 }
  0x41   :  { %608 = vmatpush.msra.mxu1 %v1067_v10 }
  0x43   :  { %609 = vmatpush.msra.mxu1 %v1072_v11 }
  0x45   :  { %610 = vmatpush.msra.mxu1 %v1078_v12 }
  0x9c   :  { %v144_v17 = vpop.f32.mrf.mxu0 }
  0x9d   :  { %v145_v18 = vadd.f32 %v144_v17, %v110_v16 }
  0xa3   :  { %v198_v21 = vpop.f32.mrf.mxu1 }
  0xa4   :  { %v201_v22 = vadd.f32 %v198_v21, %v145_v18 }
  0xa6   :  { %v202_v23 = vmul.f32 %v201_v22, %v1119_v20 }
  0xa8   :  { %784 = vtanh.f32 %v202_v23 }
  0xae   :  { %v785_v24 = vpop.eup %784 }
  0xaf   :  { %v204_v26 = vmul.f32 %v785_v24, %v1119_v20 }
  0xb1   :  { %v205_v27 = vadd.f32 %v204_v26, %v1122_v25 }
  0xb3   :  { %208 = vrot.lane.b32.xlu0 %v205_v27, %s977_s4  ;;  %v206_v30 = vmul.f32 0.0, %v205_v27 }
 0x125   :  { %v209_v28 = vpop.permute.xlu0 %208 }
 0x126   :  { %v211_v29 = vmul.f32 %v209_v28, %v205_v27 }
 0x128   :  { %213 = vrot.lane.b32.xlu0 %v211_v29, %s978_s20 }
 0x19a   :  { %v214_v31 = vpop.permute.xlu0 %213 }
 0x19b   :  { %v216_v32 = vadd.f32 %v214_v31, %v206_v30 }
 0x19d   :  { %786 = vtanh.f32 %v216_v32  ;;  %v264_v51 = vrot.slane %v216_v32, 4 }
 0x1a3   :  { %v787_v33 = vpop.eup %786 }
 0x1a4   :  { %219 = vrot.lane.b32.xlu1 %v787_v33, %s977_s4 }
 0x216   :  { %v220_v34 = vpop.permute.xlu1 %219 }
 0x217   :  { %v1129_v35 = vmul.f32 %v220_v34, %v205_v27 }
 0x219   :  { %227 = vrot.lane.b32.xlu2 %v1129_v35, %s977_s4  ;;  %224 = vrot.lane.b32.xlu1 %v1129_v35, %s978_s20  ;;  %v667_v37 = vrot.slane %v1129_v35, 4 }
 0x273   :  { %v228_v38 = vpop.permute.xlu2 %227 }
 0x28b   :  { %v225_v39 = vpop.permute.xlu1 %224 }
 0x28c   :  { %v230_v40 = vsel %vm114_vm0, %v225_v39, %v228_v38 }
 0x28d   :  { %v231_v41 = vsel %vm1135_vm8, %v230_v40, 0.0 }
 0x28e   :  { %761 = vmatmul.msk.f32.vlgmr.msra.gmra.mxu3 %vm177_vm9, %v231_v41 }
 0x28f   :  { %483 = vmatpush.msra.mxu3 %v1046_v0  ;;  %v111_v0 = vld [vmem:[#allocation8 + $0x8] sm:$0xff] }
 0x291   :  { %484 = vmatpush.msra.mxu3 %v1048_v1  ;;  %v147_v1 = vpop.f32.mrf.mxu0 }
 0x292   :  { %v148_v2 = vadd.f32 %v147_v1, %v111_v0 }
 0x293   :  { %485 = vmatpush.msra.mxu3 %v1052_v4 }
 0x295   :  { %486 = vmatpush.msra.mxu3 %v1057_v6 }
 0x297   :  { %487 = vmatpush.msra.mxu3 %v1062_v8 }
 0x299   :  { %488 = vmatpush.msra.mxu3 %v1067_v10 }
 0x29b   :  { %489 = vmatpush.msra.mxu3 %v1072_v11 }
 0x29d   :  { %490 = vmatpush.msra.mxu3 %v1078_v12 }
 0x311   :  { %v252_v42 = vpop.f32.mrf.mxu3 }
 0x312   :  { %v256_v43 = vrot.slane %v252_v42, 4 }
 0x314   :  { %v258_v44 = vadd.f32 %v256_v43, %v145_v18 }
 0x316   :  { %v259_v45 = vmul.f32 %v258_v44, %v1119_v20 }
 0x318   :  { %788 = vtanh.f32 %v259_v45 }
 0x31e   :  { %v789_v46 = vpop.eup %788 }
 0x31f   :  { %v261_v47 = vmul.f32 %v789_v46, %v1119_v20 }
 0x321   :  { %v262_v48 = vadd.f32 %v261_v47, %v1122_v25 }
 0x323   :  { %268 = vrot.lane.b32.xlu2 %v262_v48, %s977_s4  ;;  %v266_v52 = vmul.f32 %v264_v51, %v262_v48 }
 0x37d   :  { %v269_v49 = vpop.permute.xlu2 %268 }
 0x37e   :  { %v271_v50 = vmul.f32 %v269_v49, %v262_v48 }
 0x380   :  { %273 = vrot.lane.b32.xlu0 %v271_v50, %s978_s20  ;;  %v104_v50 = vld [vmem:[#allocation2 + $0x10] sm:$0xff] }
 0x381   :  { %759 = vmatmul.msk.f32.gmra.mxu0 %vm114_vm0, %v104_v50 }
 0x3f2   :  { %v274_v53 = vpop.permute.xlu0 %273 }
 0x3f3   :  { %v276_v54 = vadd.f32 %v274_v53, %v266_v52 }
 0x3f5   :  { %790 = vtanh.f32 %v276_v54  ;;  %v324_v11 = vrot.slane %v276_v54, 4 }
 0x3fb   :  { %v791_v55 = vpop.eup %790 }
 0x3fc   :  { %279 = vrot.lane.b32.xlu1 %v791_v55, %s977_s4 }
 0x46e   :  { %v280_v56 = vpop.permute.xlu1 %279 }
 0x46f   :  { %v1157_v57 = vmul.f32 %v280_v56, %v262_v48  ;;  %v112_v56 = vld [vmem:[#allocation8 + $0x10] sm:$0xff] }
 0x471   :  { %287 = vrot.lane.b32.xlu0 %v1157_v57, %s977_s4  ;;  %284 = vrot.lane.b32.xlu2 %v1157_v57, %s978_s20  ;;  %v643_v40 = vrot.slane %v1157_v57, 2  ;;  %v150_v57 = vpop.f32.mrf.mxu0 }
 0x472   :  { %v151_v58 = vadd.f32 %v150_v57, %v112_v56 }
 0x473   :  { %v657_v45 = vsel %vm656_vm10, %v1129_v35, %v643_v40  ;;  %v698_v35 = vld [vmem:[#allocation10 + $0x28] sm:$0xff] }
 0x4cb   :  { %v285_v59 = vpop.permute.xlu2 %284 }
 0x4e3   :  { %v288_v60 = vpop.permute.xlu0 %287 }
 0x4e4   :  { %v290_v61 = vsel %vm114_vm0, %v285_v59, %v288_v60 }
 0x4e5   :  { %v292_v62 = vrot.slane %v290_v61, 4 }
 0x4e7   :  { %v294_v63 = vsel %vm1135_vm8, %v292_v62, 0.0 }
 0x4e8   :  { %762 = vmatmul.msk.f32.vlgmr.msrb.gmra.mxu3 %vm177_vm9, %v294_v63 }
 0x56b   :  { %v315_v3 = vpop.f32.mrf.mxu3 }
 0x56c   :  { %v318_v4 = vadd.f32 %v315_v3, %v148_v2 }
 0x56e   :  { %v319_v5 = vmul.f32 %v318_v4, %v1119_v20 }
 0x570   :  { %792 = vtanh.f32 %v319_v5 }
 0x576   :  { %v793_v6 = vpop.eup %792 }
 0x577   :  { %v321_v7 = vmul.f32 %v793_v6, %v1119_v20 }
 0x579   :  { %v322_v8 = vadd.f32 %v321_v7, %v1122_v25 }
 0x57b   :  { %328 = vrot.lane.b32.xlu1 %v322_v8, %s977_s4  ;;  %v326_v12 = vmul.f32 %v324_v11, %v322_v8 }
 0x5ed   :  { %v329_v9 = vpop.permute.xlu1 %328 }
 0x5ee   :  { %v331_v10 = vmul.f32 %v329_v9, %v322_v8 }
 0x5f0   :  { %333 = vrot.lane.b32.xlu2 %v331_v10, %s978_s20 }
 0x64a   :  { %v334_v13 = vpop.permute.xlu2 %333 }
 0x64b   :  { %v336_v14 = vadd.f32 %v334_v13, %v326_v12 }
 0x64d   :  { %794 = vtanh.f32 %v336_v14  ;;  %v384_v33 = vrot.slane %v336_v14, 4 }
 0x653   :  { %v795_v15 = vpop.eup %794 }
 0x654   :  { %339 = vrot.lane.b32.xlu0 %v795_v15, %s977_s4 }
 0x6c6   :  { %v340_v16 = vpop.permute.xlu0 %339 }
 0x6c7   :  { %v342_v17 = vmul.f32 %v340_v16, %v322_v8 }
 0x6c9   :  { %347 = vrot.lane.b32.xlu2 %v342_v17, %s977_s4  ;;  %344 = vrot.lane.b32.xlu1 %v342_v17, %s978_s20  ;;  %v645_v42 = vrot.slane %v342_v17, 4 }
 0x6cb   :  { %v659_v46 = vsel %vm658_vm11, %v657_v45, %v645_v42 }
 0x723   :  { %v348_v18 = vpop.permute.xlu2 %347 }
 0x73b   :  { %v345_v19 = vpop.permute.xlu1 %344 }
 0x73c   :  { %v350_v21 = vsel %vm114_vm0, %v345_v19, %v348_v18 }
 0x73d   :  { %v351_v22 = vsel %vm1135_vm8, %v350_v21, 0.0 }
 0x73e   :  { %763 = vmatmul.msk.f32.vlgmr.msrb.gmra.mxu1 %vm177_vm9, %v351_v22 }
 0x7bb   :  { %v372_v23 = vpop.f32.mrf.mxu1 }
 0x7bc   :  { %v376_v24 = vrot.slane %v372_v23, 4 }
 0x7be   :  { %v378_v26 = vadd.f32 %v376_v24, %v148_v2 }
 0x7c0   :  { %v379_v27 = vmul.f32 %v378_v26, %v1119_v20 }
 0x7c2   :  { %796 = vtanh.f32 %v379_v27 }
 0x7c8   :  { %v797_v28 = vpop.eup %796 }
 0x7c9   :  { %v381_v29 = vmul.f32 %v797_v28, %v1119_v20 }
 0x7cb   :  { %v382_v30 = vadd.f32 %v381_v29, %v1122_v25 }
 0x7cd   :  { %388 = vrot.lane.b32.xlu0 %v382_v30, %s977_s4  ;;  %v386_v34 = vmul.f32 %v384_v33, %v382_v30 }
 0x83f   :  { %v389_v31 = vpop.permute.xlu0 %388 }
 0x840   :  { %v391_v32 = vmul.f32 %v389_v31, %v382_v30 }
 0x842   :  { %393 = vrot.lane.b32.xlu1 %v391_v32, %s978_s20  ;;  %v105_v32 = vld [vmem:[#allocation2 + $0x18] sm:$0xff] }
 0x843   :  { %760 = vmatmul.msk.f32.gmra.mxu0 %vm114_vm0, %v105_v32  ;;  %v693_v32 = vld [vmem:[#allocation10] sm:$0xff] }
 0x8b4   :  { %v394_v36 = vpop.permute.xlu1 %393 }
 0x8b5   :  { %v396_v38 = vadd.f32 %v394_v36, %v386_v34 }
 0x8b7   :  { %798 = vtanh.f32 %v396_v38  ;;  %v444_v3 = vrot.slane %v396_v38, 4 }
 0x8bd   :  { %v799_v39 = vpop.eup %798 }
 0x8be   :  { %399 = vrot.lane.b32.xlu2 %v799_v39, %s977_s4 }
 0x918   :  { %v400_v41 = vpop.permute.xlu2 %399 }
 0x919   :  { %v402_v43 = vmul.f32 %v400_v41, %v382_v30  ;;  %v113_v41 = vld [vmem:[#allocation8 + $0x18] sm:$0xff] }
 0x91b   :  { %v647_v44 = vrot.slane %v402_v43, 6  ;;  %407 = vrot.lane.b32.xlu1 %v402_v43, %s977_s4  ;;  %404 = vrot.lane.b32.xlu0 %v402_v43, %s978_s20 }
 0x91d   :  { %v1193_v47 = vsel %vm660_vm12, %v659_v46, %v647_v44  ;;  %v672_v48 = vsel %vm656_vm10, %v647_v44, %v342_v17 }
 0x91e   :  { %v1197_v49 = vsel %vm658_vm11, %v672_v48, %v643_v40  ;;  %v153_v40 = vpop.f32.mrf.mxu0 }
 0x91f   :  { %v154_v42 = vadd.f32 %v153_v40, %v113_v41  ;;  %v783_v40 = vld [vmem:[%s1290_s5] ss:$0 sm:$0xff] }
 0x98d   :  { %v408_v51 = vpop.permute.xlu1 %407  ;;  %v405_v52 = vpop.permute.xlu0 %404 }
 0x98e   :  { %v410_v53 = vsel %vm114_vm0, %v405_v52, %v408_v51 }
 0x98f   :  { %v412_v54 = vrot.slane %v410_v53, 4 }
 0x991   :  { %v414_v55 = vsel %vm1135_vm8, %v412_v54, 0.0 }
 0x992   :  { %764 = vmatmul.msk.f32.vlgmr.msra.gmra.mxu2 %vm177_vm9, %v414_v55 }
 0xa15   :  { %v435_v59 = vpop.f32.mrf.mxu2 }
 0xa16   :  { %v438_v60 = vadd.f32 %v435_v59, %v151_v58 }
 0xa18   :  { %v439_v61 = vmul.f32 %v438_v60, %v1119_v20 }
 0xa1a   :  { %800 = vtanh.f32 %v439_v61 }
 0xa20   :  { %v801_v62 = vpop.eup %800 }
 0xa21   :  { %v441_v63 = vmul.f32 %v801_v62, %v1119_v20 }
 0xa23   :  { %v442_v0 = vadd.f32 %v441_v63, %v1122_v25 }
 0xa25   :  { %448 = vrot.lane.b32.xlu2 %v442_v0, %s977_s4  ;;  %v446_v4 = vmul.f32 %v444_v3, %v442_v0 }
 0xa7f   :  { %v449_v1 = vpop.permute.xlu2 %448 }
 0xa80   :  { %v451_v2 = vmul.f32 %v449_v1, %v442_v0 }
 0xa82   :  { %453 = vrot.lane.b32.xlu0 %v451_v2, %s978_s20 }
 0xaf4   :  { %v454_v5 = vpop.permute.xlu0 %453 }
 0xaf5   :  { %v456_v6 = vadd.f32 %v454_v5, %v446_v4 }
 0xaf7   :  { %802 = vtanh.f32 %v456_v6  ;;  %v504_v24 = vrot.slane %v456_v6, 4 }
 0xafd   :  { %v803_v7 = vpop.eup %802 }
 0xafe   :  { %459 = vrot.lane.b32.xlu1 %v803_v7, %s977_s4  ;;  %v674_v7 = vsel %vm660_vm12, %v1197_v49, %v667_v37  ;;  %v697_v49 = vld [vmem:[#allocation10 + $0x20] sm:$0xff] }
 0xb70   :  { %v460_v8 = vpop.permute.xlu1 %459 }
 0xb71   :  { %v1210_v9 = vmul.f32 %v460_v8, %v442_v0 }
 0xb73   :  { %467 = vrot.lane.b32.xlu0 %v1210_v9, %s977_s4  ;;  %464 = vrot.lane.b32.xlu2 %v1210_v9, %s978_s20 }
 0xbcd   :  { %v465_v10 = vpop.permute.xlu2 %464 }
 0xbe5   :  { %v468_v11 = vpop.permute.xlu0 %467 }
 0xbe6   :  { %v470_v12 = vsel %vm114_vm0, %v465_v10, %v468_v11 }
 0xbe7   :  { %v471_v13 = vsel %vm1135_vm8, %v470_v12, 0.0 }
 0xbe8   :  { %765 = vmatmul.msk.f32.vlgmr.msra.gmra.mxu3 %vm177_vm9, %v471_v13 }
 0xc6b   :  { %v492_v14 = vpop.f32.mrf.mxu3 }
 0xc6c   :  { %v496_v15 = vrot.slane %v492_v14, 4  ;;  %v699_v14 = vld [vmem:[#allocation10 + $0x30] sm:$0xff] }
 0xc6e   :  { %v498_v16 = vadd.f32 %v496_v15, %v151_v58  ;;  %v696_v15 = vld [vmem:[#allocation10 + $0x18] sm:$0xff] }
 0xc70   :  { %v499_v17 = vmul.f32 %v498_v16, %v1119_v20  ;;  %v695_v16 = vld [vmem:[#allocation10 + $0x10] sm:$0xff] }
 0xc72   :  { %804 = vtanh.f32 %v499_v17 }
 0xc78   :  { %v805_v18 = vpop.eup %804 }
 0xc79   :  { %v501_v19 = vmul.f32 %v805_v18, %v1119_v20 }
 0xc7b   :  { %v502_v21 = vadd.f32 %v501_v19, %v1122_v25 }
 0xc7d   :  { %508 = vrot.lane.b32.xlu1 %v502_v21, %s977_s4  ;;  %v506_v26 = vmul.f32 %v504_v24, %v502_v21 }
 0xcef   :  { %v509_v22 = vpop.permute.xlu1 %508 }
 0xcf0   :  { %v511_v23 = vmul.f32 %v509_v22, %v502_v21 }
 0xcf2   :  { %513 = vrot.lane.b32.xlu2 %v511_v23, %s978_s20 }
 0xd4c   :  { %v514_v27 = vpop.permute.xlu2 %513 }
 0xd4d   :  { %v516_v28 = vadd.f32 %v514_v27, %v506_v26 }
 0xd4f   :  { %806 = vtanh.f32 %v516_v28  ;;  %v564_v53 = vrot.slane %v516_v28, 4  ;;  %v665_v28 = vrot.slane %v1210_v9, 4 }
 0xd55   :  { %v807_v29 = vpop.eup %806 }
 0xd56   :  { %519 = vrot.lane.b32.xlu0 %v807_v29, %s977_s4 }
 0xdc8   :  { %v520_v30 = vpop.permute.xlu0 %519 }
 0xdc9   :  { %v1226_v31 = vmul.f32 %v520_v30, %v502_v21 }
 0xdcb   :  { %527 = vrot.lane.b32.xlu2 %v1226_v31, %s977_s4  ;;  %524 = vrot.lane.b32.xlu1 %v1226_v31, %s978_s20  ;;  %v649_v17 = vrot.slane %v1226_v31, 2  ;;  %v694_v31 = vld [vmem:[#allocation10 + $0x8] sm:$0xff] }
 0xdcd   :  { %v662_v23 = vsel %vm656_vm10, %v1210_v9, %v649_v17 }
 0xe25   :  { %v528_v33 = vpop.permute.xlu2 %527 }
 0xe3d   :  { %v525_v34 = vpop.permute.xlu1 %524 }
 0xe3e   :  { %v530_v36 = vsel %vm114_vm0, %v525_v34, %v528_v33 }
 0xe3f   :  { %v532_v38 = vrot.slane %v530_v36, 4 }
 0xe41   :  { %v534_v39 = vsel %vm1135_vm8, %v532_v38, 0.0 }
 0xe42   :  { %766 = vmatmul.msk.f32.vlgmr.msrb.gmra.mxu0 %vm177_vm9, %v534_v39 }
 0xebf   :  { %v555_v43 = vpop.f32.mrf.mxu0 }
 0xec0   :  { %v558_v44 = vadd.f32 %v555_v43, %v154_v42 }
 0xec2   :  { %v559_v45 = vmul.f32 %v558_v44, %v1119_v20 }
 0xec4   :  { %808 = vtanh.f32 %v559_v45 }
 0xeca   :  { %v809_v46 = vpop.eup %808 }
 0xecb   :  { %v561_v48 = vmul.f32 %v809_v46, %v1119_v20 }
 0xecd   :  { %v562_v50 = vadd.f32 %v561_v48, %v1122_v25 }
 0xecf   :  { %568 = vrot.lane.b32.xlu0 %v562_v50, %s977_s4  ;;  %v566_v54 = vmul.f32 %v564_v53, %v562_v50 }
 0xf41   :  { %v569_v51 = vpop.permute.xlu0 %568 }
 0xf42   :  { %v571_v52 = vmul.f32 %v569_v51, %v562_v50 }
 0xf44   :  { %573 = vrot.lane.b32.xlu1 %v571_v52, %s978_s20 }
 0xfb6   :  { %v574_v55 = vpop.permute.xlu1 %573 }
 0xfb7   :  { %v576_v56 = vadd.f32 %v574_v55, %v566_v54 }
 0xfb9   :  { %810 = vtanh.f32 %v576_v56  ;;  %v624_v11 = vrot.slane %v576_v56, 4 }
 0xfbf   :  { %v811_v57 = vpop.eup %810 }
 0xfc0   :  { %579 = vrot.lane.b32.xlu2 %v811_v57, %s977_s4 }
0x101a   :  { %v580_v58 = vpop.permute.xlu2 %579 }
0x101b   :  { %v582_v59 = vmul.f32 %v580_v58, %v562_v50 }
0x101d   :  { %587 = vrot.lane.b32.xlu1 %v582_v59, %s977_s4  ;;  %584 = vrot.lane.b32.xlu0 %v582_v59, %s978_s20  ;;  %v651_v19 = vrot.slane %v582_v59, 4 }
0x101f   :  { %v663_v24 = vsel %vm658_vm11, %v662_v23, %v651_v19 }
0x108f   :  { %v588_v60 = vpop.permute.xlu1 %587  ;;  %v585_v61 = vpop.permute.xlu0 %584 }
0x1090   :  { %v590_v62 = vsel %vm114_vm0, %v585_v61, %v588_v60 }
0x1091   :  { %v591_v63 = vsel %vm1135_vm8, %v590_v62, 0.0 }
0x1092   :  { %767 = vmatmul.msk.f32.vlgmr.msra.gmra.mxu1 %vm177_vm9, %v591_v63 }
0x110f   :  { %v612_v0 = vpop.f32.mrf.mxu1 }
0x1110   :  { %v616_v1 = vrot.slane %v612_v0, 4 }
0x1112   :  { %v618_v2 = vadd.f32 %v616_v1, %v154_v42 }
0x1114   :  { %v619_v3 = vmul.f32 %v618_v2, %v1119_v20 }
0x1116   :  { %812 = vtanh.f32 %v619_v3 }
0x111c   :  { %v813_v4 = vpop.eup %812 }
0x111d   :  { %v621_v5 = vmul.f32 %v813_v4, %v1119_v20 }
0x111f   :  { %v622_v6 = vadd.f32 %v621_v5, %v1122_v25 }
0x1121   :  { %628 = vrot.lane.b32.xlu2 %v622_v6, %s977_s4  ;;  %v626_v20 = vmul.f32 %v624_v11, %v622_v6 }
0x1129   :  { %677 = vrot.lane.b32.xlu2 %v1193_v47, %s978_s20  ;;  %v700_v47 = vld [vmem:[#allocation10 + $0x38] sm:$0xff] }
0x112a   :  { %719 = vmatpush.msrb.mxu2 %v700_v47 }
0x112c   :  { %720 = vmatpush.msrb.mxu2 %v699_v14 }
0x112e   :  { %721 = vmatpush.msrb.mxu2 %v698_v35 }
0x1130   :  { %722 = vmatpush.msrb.mxu2 %v697_v49 }
0x1131   :  { %687 = vrot.lane.b32.xlu2 %v674_v7, %s977_s4 }
0x1132   :  { %723 = vmatpush.msrb.mxu2 %v696_v15 }
0x1134   :  { %724 = vmatpush.msrb.mxu2 %v695_v16 }
0x1136   :  { %725 = vmatpush.msrb.mxu2 %v694_v31 }
0x1138   :  { %726 = vmatpush.msrb.mxu2 %v693_v32 }
0x117b   :  { %v629_v8 = vpop.permute.xlu2 %628 }
0x117c   :  { %v631_v10 = vmul.f32 %v629_v8, %v622_v6 }
0x117e   :  { %633 = vrot.lane.b32.xlu0 %v631_v10, %s978_s20 }
0x1183   :  { %v678_v33 = vpop.permute.xlu2 %677 }
0x118b   :  { %v688_v9 = vpop.permute.xlu2 %687 }
0x11f0   :  { %v634_v12 = vpop.permute.xlu0 %633 }
0x11f1   :  { %v636_v25 = vadd.f32 %v634_v12, %v626_v20 }
0x11f3   :  { %814 = vtanh.f32 %v636_v25 }
0x11f9   :  { %v815_v13 = vpop.eup %814 }
0x11fa   :  { %639 = vrot.lane.b32.xlu1 %v815_v13, %s977_s4 }
0x126c   :  { %v640_v18 = vpop.permute.xlu1 %639 }
0x126d   :  { %v642_v21 = vmul.f32 %v640_v18, %v622_v6 }
0x126f   :  { %v654_v22 = vrot.slane %v642_v21, 6 }
0x1271   :  { %v669_v26 = vsel %vm656_vm10, %v654_v22, %v582_v59  ;;  %v664_v27 = vsel %vm660_vm12, %v663_v24, %v654_v22 }
0x1272   :  { %679 = vrot.lane.b32.xlu1 %v664_v27, %s978_s20  ;;  %v670_v29 = vsel %vm658_vm11, %v669_v26, %v649_v17 }
0x1273   :  { %v671_v30 = vsel %vm660_vm12, %v670_v29, %v665_v28 }
0x1274   :  { %685 = vrot.lane.b32.xlu0 %v671_v30, %s977_s4 }
0x12e4   :  { %v680_v38 = vpop.permute.xlu1 %679 }
0x12e5   :  { %v692_v39 = vsel %vm114_vm0, %v680_v38, %v688_v9 }
0x12e6   :  { %v686_v34 = vpop.permute.xlu0 %685 }
0x12e7   :  { %v691_v36 = vsel %vm114_vm0, %v678_v33, %v686_v34 }
0x12e8   :  { %768 = vmatmul.msk.f32.vlgmr.msrb.gmra.mxu2 %vm177_vm9, %v691_v36 }
0x12f0   :  { %769 = vmatmul.msk.f32.gmra.mxu2 %vm177_vm9, %v692_v39 }
0x136b   :  { %v728_v41 = vpop.f32.mrf.mxu2 }
0x136c   :  { %v729_v42 = vadd.f32 %v783_v40, %v728_v41 }
0x136e   :  { %734 = vst [vmem:[#allocation11] sm:$0xff] %v729_v42 }
0x1373   :  { %v731_v43 = vpop.f32.mrf.mxu2 }
0x1374   :  { %v732_v44 = vadd.f32 %v783_v40, %v731_v43 }
0x1376   :  { %735 = vst [vmem:[#allocation11 + $0x8] sm:$0xff] %v732_v44 }
0x1377   :  { %748 = dma.vmem_to_hbm [thread:$0]  %s741_s24, 256, %s743_s27, [#allocation4], %s969_s29, %s969_s29, %s970_s30  }
0x1378   :  { %966 = dma.done.wait [#allocation4], 256  }
0x1379   :  { %967 = vsyncadd [#allocation4], 4294967040 }
0x137a   :  { %753 = vsyncpa [#allocation3], 1 }
0x137b   :  { %754 = vsyncpa [#allocation6], 1 }
0x137c   :  { %755 = vsyncpa [#allocation9], 1 }
0x137d   :  { %756 = vsyncpa [#allocation4], 1 }

</bundles_post_ra>
